<compile_context>
chip_gen: v6e
topology: v6e:2x2x1
jax: 0.10.0
libtpu: 0.0.40
codegen_flags: <defaults>
</compile_context>

<pallas_src>
import numpy as np
import jax
import jax.numpy as jnp
from jax.experimental import pallas as pl
from jax.experimental.pallas import tpu as pltpu


def _gradient_kernel(rmask_ref, xprev_ref, x_ref, xnext_ref, o_ref):
    cdt = rmask_ref.dtype
    x = x_ref[...].astype(cdt)                      # (R, W) block of image rows
    R, W = x.shape

    # 1-row vertical halo: last row of the 8-row block just above this block and
    # first row of the 8-row block just below it. The index maps are clamped at
    # the array ends; clamped values are only ever read where the plane-boundary
    # mask zeroes the tap anyway.
    top_halo = xprev_ref[7:8, :].astype(cdt)        # global row (block_start - 1)
    bot_halo = xnext_ref[0:1, :].astype(cdt)        # global row (block_end)

    up_ok = rmask_ref[:, 0:1] > 0                   # row is not the first row of its plane
    dn_ok = rmask_ref[:, 1:2] > 0                   # row is not the last row of its plane

    zero = jnp.zeros((), cdt)
    up = jnp.where(up_ok, jnp.concatenate([top_halo, x[:-1, :]], axis=0), zero)  # x[h-1, w]
    dn = jnp.where(dn_ok, jnp.concatenate([x[1:, :], bot_halo], axis=0), zero)   # x[h+1, w]

    # Separable Sobel (cross-correlation, matches F.conv2d):
    s = up + 2.0 * x + dn                           # vertical smooth [1, 2, 1]^T
    d = up - dn                                     # vertical diff   [1, 0, -1]^T

    # Horizontal taps with zero padding via a concatenated zero column:
    # no rolls, no masks, no extra full-tile multiplies.
    zcol = jnp.zeros((R, 1), cdt)
    s_l = jnp.concatenate([zcol, s[:, :W - 1]], axis=1)   # s[h, w-1]
    s_r = jnp.concatenate([s[:, 1:], zcol], axis=1)       # s[h, w+1]
    d_l = jnp.concatenate([zcol, d[:, :W - 1]], axis=1)
    d_r = jnp.concatenate([d[:, 1:], zcol], axis=1)

    dx = s_l - s_r                                  # [[1,0,-1],[2,0,-2],[1,0,-1]]
    dy = d_l + 2.0 * d + d_r                        # its transpose
    o_ref[...] = (jnp.abs(dx) + jnp.abs(dy)).astype(o_ref.dtype)


def _rows_per_block(total_rows: int, w: int) -> int:
    """Image rows (sublanes) per grid step.

    Sized so the main f32-equivalent working tile stays ~1 MiB regardless of
    image size (no VMEM cliff; safe on v5e/v6e 128 MiB and v7x 64 MiB), while
    keeping >= 4 grid steps when there is enough work so v7x can shard the
    parallel axis across its two TensorCores and the pipeline has depth.
    Always a multiple of 8 (sublane tiling constraint).
    """
    target_bytes = 1 << 20
    r = max(8, (target_bytes // (w * 4)) // 8 * 8)
    if total_rows >= 32:
        quarter = -(-total_rows // 4)               # cdiv(total_rows, 4)
        r = min(r, -(-quarter // 8) * 8)            # round up to multiple of 8
    return min(r, -(-total_rows // 8) * 8)


def gradient(x: jax.Array) -> jax.Array:
    """Pallas equivalent of Gradient.forward. x: (N, C, H, W)."""
    N, C, H, W = x.shape
    total_rows = N * C * H
    if H < 3 or W < 3 or total_rows < 8:
        # Degenerate cases for the 3x3 stencil / tiling: use the XLA conv path.
        return _reference(x)

    # Compute dtype: bf16 stays bf16 (v6e/v7x bf16 VALU, halves in-core traffic),
    # everything else computes in f32.
    cdt = jnp.bfloat16 if x.dtype == jnp.bfloat16 else jnp.float32

    xr = x.reshape(total_rows, W)                   # free view (contiguous), lanes = columns

    # Host-precomputed plane-boundary masks: col 0 -> row has a valid up tap
    # (not the first row of its plane), col 1 -> valid down tap.
    r_in_plane = np.arange(total_rows) % H
    row_masks = jnp.asarray(
        np.stack([r_in_plane != 0, r_in_plane != H - 1], axis=1).astype(np.float32),
        dtype=cdt)                                  # (total_rows, 2)

    R = _rows_per_block(total_rows, W)
    r8 = R // 8
    nb8 = -(-total_rows // 8)                       # number of 8-row halo blocks
    grid = (-(-total_rows // R),)

    out = pl.pallas_call(
        _gradient_kernel,
        out_shape=jax.ShapeDtypeStruct((total_rows, W), x.dtype),
        grid=grid,
        in_specs=[
            pl.BlockSpec((R, 2), lambda i: (i, 0)),                               # row masks
            pl.BlockSpec((8, W), lambda i: (jnp.maximum(i * r8 - 1, 0), 0)),      # halo above
            pl.BlockSpec((R, W), lambda i: (i, 0)),                               # main rows
            pl.BlockSpec((8, W), lambda i: (jnp.minimum((i + 1) * r8, nb8 - 1), 0)),  # halo below
        ],
        out_specs=pl.BlockSpec((R, W), lambda i: (i, 0)),
        compiler_params=pltpu.CompilerParams(
            dimension_semantics=("parallel",),
            vmem_limit_bytes=32 * 1024 * 1024),
    )(row_masks, xr, xr, xr)
    return out.reshape(N, C, H, W)


def _reference(x: jax.Array) -> jax.Array:
    """Pure-JAX reference via lax.conv (depthwise) for a correctness check."""
    N, C, H, W = x.shape
    sobel_x = jnp.array([[1, 0, -1], [2, 0, -2], [1, 0, -1]], dtype=x.dtype)
    sobel_y = sobel_x.T

    def dwconv(inp, k):
        kern = jnp.broadcast_to(k, (C, 1, 3, 3))
        return jax.lax.conv_general_dilated(
            inp, kern, window_strides=(1, 1), padding=((1, 1), (1, 1)),
            dimension_numbers=("NCHW", "OIHW", "NCHW"),
            feature_group_count=C)

    dx = dwconv(x, sobel_x)
    dy = dwconv(x, sobel_y)
    return jnp.abs(dx) + jnp.abs(dy)


if __name__ == "__main__":
    key = jax.random.PRNGKey(0)
    x = jax.random.normal(key, (2, 4, 16, 16), dtype=jnp.float32)

    out = gradient(x)
    jax.block_until_ready(out)

    ref = _reference(x)
    assert out.shape == ref.shape == (2, 4, 16, 16)
    assert jnp.allclose(out, ref, atol=1e-4, rtol=1e-4), float(
        jnp.max(jnp.abs(out - ref)))

    # bf16 path (computes in bf16 on-chip); compare loosely against f32 reference.
    xb = x.astype(jnp.bfloat16)
    out_b = gradient(xb)
    jax.block_until_ready(out_b)
    ref_b = _reference(xb.astype(jnp.float32))
    assert jnp.allclose(out_b.astype(jnp.float32), ref_b, atol=0.25, rtol=0.05), float(
        jnp.max(jnp.abs(out_b.astype(jnp.float32) - ref_b)))

    print("KERNEL_OK")
</pallas_src>

<mosaic_0001>
module attributes {stable_mosaic.version = 11 : i64} {
  func.func @_gradient_kernel(%arg0: i32, %arg1: memref<32x2xf32, #tpu.memory_space<vmem>>, %arg2: memref<8x16xf32, #tpu.memory_space<vmem>>, %arg3: memref<32x16xf32, #tpu.memory_space<vmem>>, %arg4: memref<8x16xf32, #tpu.memory_space<vmem>>, %arg5: memref<32x16xf32, #tpu.memory_space<vmem>>) attributes {dimension_semantics = [#tpu.dimension_semantics<parallel>], iteration_bounds = array<i64: 4>, scalar_prefetch = 0 : i64, scratch_operands = 0 : i64, tpu.core_type = #tpu.core_type<tc>, window_params = [{transform_indices = @transform_0, window_bounds = array<i64: 32, 2>}, {transform_indices = @transform_1, window_bounds = array<i64: 8, 16>}, {transform_indices = @transform_2, window_bounds = array<i64: 32, 16>}, {transform_indices = @transform_3, window_bounds = array<i64: 8, 16>}, {transform_indices = @transform_4, window_bounds = array<i64: 32, 16>}]} {
    %c0 = arith.constant 0 : index
    %c0_0 = arith.constant 0 : index
    %0 = vector.load %arg3[%c0, %c0_0] : memref<32x16xf32, #tpu.memory_space<vmem>>, vector<32x16xf32>
    %c7 = arith.constant 7 : index
    %c0_1 = arith.constant 0 : index
    %1 = vector.load %arg2[%c7, %c0_1] : memref<8x16xf32, #tpu.memory_space<vmem>>, vector<1x16xf32>
    %c0_2 = arith.constant 0 : index
    %c0_3 = arith.constant 0 : index
    %2 = vector.load %arg4[%c0_2, %c0_3] : memref<8x16xf32, #tpu.memory_space<vmem>>, vector<1x16xf32>
    %c0_4 = arith.constant 0 : index
    %c0_5 = arith.constant 0 : index
    %3 = vector.load %arg1[%c0_4, %c0_5] : memref<32x2xf32, #tpu.memory_space<vmem>>, vector<32x1xf32>
    %cst = arith.constant 0.000000e+00 : f32
    %4 = vector.broadcast %cst : f32 to vector<32x1xf32>
    %5 = arith.cmpf ogt, %3, %4 : vector<32x1xf32>
    %c0_6 = arith.constant 0 : index
    %c1 = arith.constant 1 : index
    %6 = vector.load %arg1[%c0_6, %c1] : memref<32x2xf32, #tpu.memory_space<vmem>>, vector<32x1xf32>
    %cst_7 = arith.constant 0.000000e+00 : f32
    %7 = vector.broadcast %cst_7 : f32 to vector<32x1xf32>
    %8 = arith.cmpf ogt, %6, %7 : vector<32x1xf32>
    %9 = vector.extract_strided_slice %0 {offsets = [0, 0], sizes = [31, 16], strides = [1, 1]} : vector<32x16xf32> to vector<31x16xf32>
    %10 = tpu.concatenate %1, %9 in 0 : vector<1x16xf32>, vector<31x16xf32> -> vector<32x16xf32>
    %cst_8 = arith.constant 0.000000e+00 : f32
    %11 = vector.shape_cast %5 : vector<32x1xi1> to vector<32x1xi1>
    %12 = vector.broadcast %11 : vector<32x1xi1> to vector<32x16xi1>
    %13 = vector.broadcast %cst_8 : f32 to vector<32x16xf32>
    %14 = arith.select %12, %10, %13 : vector<32x16xi1>, vector<32x16xf32>
    %15 = vector.extract_strided_slice %0 {offsets = [1, 0], sizes = [31, 16], strides = [1, 1]} : vector<32x16xf32> to vector<31x16xf32>
    %16 = tpu.concatenate %15, %2 in 0 : vector<31x16xf32>, vector<1x16xf32> -> vector<32x16xf32>
    %cst_9 = arith.constant 0.000000e+00 : f32
    %17 = vector.shape_cast %8 : vector<32x1xi1> to vector<32x1xi1>
    %18 = vector.broadcast %17 : vector<32x1xi1> to vector<32x16xi1>
    %19 = vector.broadcast %cst_9 : f32 to vector<32x16xf32>
    %20 = arith.select %18, %16, %19 : vector<32x16xi1>, vector<32x16xf32>
    %cst_10 = arith.constant 2.000000e+00 : f32
    %21 = vector.broadcast %cst_10 : f32 to vector<32x16xf32>
    %22 = arith.mulf %21, %0 : vector<32x16xf32>
    %23 = arith.addf %14, %22 : vector<32x16xf32>
    %24 = arith.addf %23, %20 : vector<32x16xf32>
    %25 = arith.subf %14, %20 : vector<32x16xf32>
    %cst_11 = arith.constant 0.000000e+00 : f32
    %26 = vector.broadcast %cst_11 : f32 to vector<32x1xf32>
    %27 = vector.extract_strided_slice %24 {offsets = [0, 0], sizes = [32, 15], strides = [1, 1]} : vector<32x16xf32> to vector<32x15xf32>
    %28 = tpu.concatenate %26, %27 in 1 : vector<32x1xf32>, vector<32x15xf32> -> vector<32x16xf32>
    %29 = vector.extract_strided_slice %24 {offsets = [0, 1], sizes = [32, 15], strides = [1, 1]} : vector<32x16xf32> to vector<32x15xf32>
    %30 = tpu.concatenate %29, %26 in 1 : vector<32x15xf32>, vector<32x1xf32> -> vector<32x16xf32>
    %31 = vector.extract_strided_slice %25 {offsets = [0, 0], sizes = [32, 15], strides = [1, 1]} : vector<32x16xf32> to vector<32x15xf32>
    %32 = tpu.concatenate %26, %31 in 1 : vector<32x1xf32>, vector<32x15xf32> -> vector<32x16xf32>
    %33 = vector.extract_strided_slice %25 {offsets = [0, 1], sizes = [32, 15], strides = [1, 1]} : vector<32x16xf32> to vector<32x15xf32>
    %34 = tpu.concatenate %33, %26 in 1 : vector<32x15xf32>, vector<32x1xf32> -> vector<32x16xf32>
    %35 = arith.subf %28, %30 : vector<32x16xf32>
    %cst_12 = arith.constant 2.000000e+00 : f32
    %36 = vector.broadcast %cst_12 : f32 to vector<32x16xf32>
    %37 = arith.mulf %36, %25 : vector<32x16xf32>
    %38 = arith.addf %32, %37 : vector<32x16xf32>
    %39 = arith.addf %38, %34 : vector<32x16xf32>
    %40 = math.absf %35 : vector<32x16xf32>
    %41 = math.absf %39 : vector<32x16xf32>
    %42 = arith.addf %40, %41 : vector<32x16xf32>
    %c0_13 = arith.constant 0 : index
    %c0_14 = arith.constant 0 : index
    %43 = vector.load %arg5[%c0_13, %c0_14] : memref<32x16xf32, #tpu.memory_space<vmem>>, vector<32x16xf32>
    tpu.vector_store %arg5[%c0_13, %c0_14], %42 {strides = array<i32>} : memref<32x16xf32, #tpu.memory_space<vmem>>, vector<32x16xf32>,
    return
  }
  func.func @transform_0(%arg0: i32) -> (i32, i32) {
    %c0_i32 = arith.constant 0 : i32
    %c0_i32_0 = arith.constant 0 : i32
    return %arg0, %c0_i32 : i32, i32
  }
  func.func @transform_1(%arg0: i32) -> (i32, i32) {
    %c4_i32 = arith.constant 4 : i32
    %0 = arith.muli %arg0, %c4_i32 : i32
    %c1_i32 = arith.constant 1 : i32
    %1 = arith.subi %0, %c1_i32 : i32
    %c0_i32 = arith.constant 0 : i32
    %2 = arith.maxsi %1, %c0_i32 : i32
    %c0_i32_0 = arith.constant 0 : i32
    %c0_i32_1 = arith.constant 0 : i32
    return %2, %c0_i32_0 : i32, i32
  }
  func.func @transform_2(%arg0: i32) -> (i32, i32) {
    %c0_i32 = arith.constant 0 : i32
    %c0_i32_0 = arith.constant 0 : i32
    return %arg0, %c0_i32 : i32, i32
  }
  func.func @transform_3(%arg0: i32) -> (i32, i32) {
    %c1_i32 = arith.constant 1 : i32
    %0 = arith.addi %arg0, %c1_i32 : i32
    %c4_i32 = arith.constant 4 : i32
    %1 = arith.muli %0, %c4_i32 : i32
    %c15_i32 = arith.constant 15 : i32
    %2 = arith.minsi %1, %c15_i32 : i32
    %c0_i32 = arith.constant 0 : i32
    %c0_i32_0 = arith.constant 0 : i32
    return %2, %c0_i32 : i32, i32
  }
  func.func @transform_4(%arg0: i32) -> (i32, i32) {
    %c0_i32 = arith.constant 0 : i32
    %c0_i32_0 = arith.constant 0 : i32
    return %arg0, %c0_i32 : i32, i32
  }
}

</mosaic_0001>

<bundles_post_ra>
// kernel: tpu_custom_call.1
= control target key start
LH: loop header
LB: loop body
LE: loop exit
PB: predicated region body
PF: predicated region fallthrough
CT: control target
= control target key end

     0   :  { %s714_s15 = smov 0   ;;  %s799_s0 = inlined_call_operand.vmem [shape: f32[128,2], index: 0, kind: input, shape index: {}]   ;;  %s800_s1 = inlined_call_operand.vmem [shape: f32[128,16], index: 1, kind: input, shape index: {}]   ;;  %s801_s2 = inlined_call_operand.vmem [shape: f32[128,16], index: 2, kind: input, shape index: {}]   ;;  %s802_s3 = inlined_call_operand.vmem [shape: f32[128,16], index: 3, kind: input, shape index: {}]   ;;  %s803_s4 = inlined_call_operand.vmem [shape: f32[128,16], index: 4, kind: output, shape index: {}]  }
   0x1 LB: > { %s619_s16 = sadd.s32 4294967295, %s683_s15   ;;  %p629_p0 = scmp.ge.s32.totalorder %s683_s15, 1  ;;  %s683_s15 = sphi %s714_s15, %s14_s15  }
   0x2   : > { %p224_p1 = scmp.lt.s32.totalorder %s683_s15, 5 }
   0x4   : > { %p225_p2 = pnand %p629_p0, %p224_p1 }
   0x5   : > { %s722_s17 = sshll.u32 (!%p225_p2), %s619_s16, 2  ;;  %s687_s12 = smov (!%p225_p2), 1  }
   0x6   : > { %228 = sbr.rel (%p225_p2) target bundleno = 306 (0x132), region = 36  ;;  %p272_p3 = scmp.lt.s32.totalorder (!%p225_p2), %s722_s17, 15 }
   0x7   : > { %s633_s18 = sadd.s32 (!%p225_p2), 4294967295, %s722_s17  ;;  %s660_s28 = sadd.s32 (!%p225_p2), 4, %s722_s17 }
   0x8   : > { %p279_p4 = scmp.gt.s32.totalorder (!%p225_p2), %s633_s18, 0  ;;  %p634_p5 = scmp.lt.s32.totalorder (!%p225_p2), %s633_s18, 15 }
   0x9   : > { %p742_p6 = scmp.lt.s32.totalorder (!%p225_p2), %s660_s28, 15  ;;  %s688_s13 = smov (!%p225_p2), 127  }
   0xb   : > { %v685_v0 = vmov 0   ;;  %s273_s19 = scalar_select %p272_p3, %s722_s17, 15  ;;  %vm331_vm4 = vcmask 1040384   ;;  %v686_v14 = vmov 1   ;;  %vm368_vm5 = vcmask 1046528  }
   0xc   : > { %674 = vset.pattern.permute.xlu1 %v685_v0  ;;  %673 = vset.pattern.permute.xlu0 %v685_v0  ;;  %s280_s20 = scalar_select %p279_p4, %s633_s18, 0  ;;  %vm436_vm14 = vcmask 7168   ;;  %vm453_vm15 = vcmask 121856  }
   0xd   : > { %s727_s21 = sshll.u32 %s273_s19, 3  ;;  %s808_s28 = smov (!%p742_p6, %s660_s28), 15 }
   0xe   : > { %s275_s24 = scalar_lea.vmem %s799_s0, %s727_s21  ;;  %s737_s27 = scalar_lea.vmem %s801_s2, %s727_s21 }
   0xf   : > { %v321_v1 = vld [vmem:[%s275_s24 + $0x10] sm:$0xff]  ;;  %v319_v2 = vld [vmem:[%s275_s24] sm:$0xff]  ;;  %v322_v3 = vld [vmem:[%s275_s24 + $0x18] sm:$0xff]  ;;  %s806_s20 = smov (!%p634_p5, %s280_s20), 15  ;;  %s810_s28 = smov (!%p742_p6, %s808_s28), 15 }
  0x10   : > { %vm325_vm0 = vcmp.gt.f32.partialorder %v321_v1, 0.0  ;;  %vm323_vm1 = vcmp.gt.f32.partialorder %v319_v2, 0.0  ;;  %vm326_vm2 = vcmp.gt.f32.partialorder %v322_v3, 0.0  ;;  %v320_v4 = vld [vmem:[%s275_s24 + $0x8] sm:$0xff]  ;;  %v313_v7 = vld [vmem:[%s737_s27] sm:$0xff]  ;;  %s639_s30 = sshll.u32 %s806_s20, 3  ;;  %s311_s17 = scalar_lea.vmem %s803_s4, %s727_s21 }
  0x11   : > { %v346_v5 = vsel %vm325_vm0, 1, %v685_v0  ;;  %v344_v6 = vsel %vm323_vm1, 1, %v685_v0  ;;  %vm324_vm3 = vcmp.gt.f32.partialorder %v320_v4, 0.0  ;;  %v347_v8 = vsel %vm326_vm2, 1, %v685_v0  ;;  %s284_s7 = scalar_lea.vmem %s800_s1, %s639_s30  ;;  %v316_v13 = vld [vmem:[%s737_s27 + $0x18] sm:$0xff]  ;;  %s646_s8 = sshll.u32 %s810_s28, 3 }
  0x12   : > { %355 = vperm.xlu1 %674, %v346_v5   ;;  %349 = vperm.xlu0 %673, %v344_v6   ;;  %v345_v9 = vsel %vm324_vm3, 1, %v685_v0  ;;  %v332_v10 = vrot.slane %v313_v7, 7  ;;  %v317_v11 = vld [vmem:[%s284_s7 + $0x7] sm:$0x1]  ;;  %v374_v15 = vrot.slane %v316_v13, 1  ;;  %s302_s11 = scalar_lea.vmem %s802_s3, %s646_s8  ;;  %v404_v19 = vmul.f32 2.0, %v313_v7 }
  0x13   : > { %v318_v16 = vld [vmem:[%s302_s11] sm:$0x1]  ;;  %v314_v22 = vld [vmem:[%s737_s27 + $0x8] sm:$0xff]  ;;  %v315_v23 = vld [vmem:[%s737_s27 + $0x10] sm:$0xff]  ;;  %v337_v26 = vrot.slane %v316_v13, 7  ;;  %v369_v31 = vrot.slane %v313_v7, 1 }
  0x14   : > { %v343_v12 = vsel %vm331_vm4, %v317_v11, %v332_v10  ;;  %v381_v17 = vrot.slane %v318_v16, 1  ;;  %v370_v29 = vrot.slane %v314_v22, 1  ;;  %v372_v30 = vrot.slane %v315_v23, 1 }
  0x15   : > { %v333_v32 = vrot.slane %v314_v22, 7  ;;  %v335_v33 = vrot.slane %v315_v23, 7  ;;  %v407_v38 = vmul.f32 2.0, %v316_v13  ;;  %v405_v59 = vmul.f32 2.0, %v314_v22 }
  0x16   : > { %358 = vperm.xlu1 %674, %v347_v8   ;;  %352 = vperm.xlu0 %673, %v345_v9   ;;  %v383_v18 = vsel %vm368_vm5, %v374_v15, %v381_v17  ;;  %v373_v36 = vsel %vm368_vm5, %v370_v29, %v372_v30  ;;  %v371_v37 = vsel %vm368_vm5, %v369_v31, %v370_v29  ;;  %v406_v60 = vmul.f32 2.0, %v315_v23 }
  0x17   : > { %v338_v34 = vsel %vm331_vm4, %v335_v33, %v337_v26  ;;  %v334_v35 = vsel %vm331_vm4, %v332_v10, %v333_v32  ;;  %v336_v41 = vsel %vm331_vm4, %v333_v32, %v335_v33  ;;  %v375_v42 = vsel %vm368_vm5, %v372_v30, %v374_v15 }
  0x18   : > { %vm522_vm0 = vcmask 130048  }
  0x1a   : > { %676 = vset.pattern.permute.xlu1 %v686_v14  ;;  %675 = vset.pattern.permute.xlu0 %v686_v14 }
  0x1b   : > { %388 = vperm.xlu1 %676, %v345_v9   ;;  %385 = vperm.xlu0 %675, %v344_v6  }
  0x1f   : > { %391 = vperm.xlu1 %676, %v346_v5   ;;  %394 = vperm.xlu0 %675, %v347_v8  }
  0x8d   : > { %v356_v20 = vpop.permute.xlu1 %355  ;;  %v350_v21 = vpop.permute.xlu0 %349 }
  0x8e   : > { %vm360_vm6 = vcmp.eq.s32.totalorder %v350_v21, 1  ;;  %vm362_vm11 = vcmp.eq.s32.totalorder %v356_v20, 1 }
  0x8f   : > { %v364_v24 = vsel %vm360_vm6, %v343_v12, 0.0  ;;  %v366_v53 = vsel %vm362_vm11, %v336_v41, 0.0 }
  0x90   : > { %v408_v25 = vadd.f32 %v404_v19, %v364_v24  ;;  %v410_v63 = vadd.f32 %v406_v60, %v366_v53 }
  0x91   : > { %v359_v27 = vpop.permute.xlu1 %358  ;;  %v353_v28 = vpop.permute.xlu0 %352 }
  0x92   : > { %vm363_vm7 = vcmp.eq.s32.totalorder %v359_v27, 1  ;;  %vm361_vm8 = vcmp.eq.s32.totalorder %v353_v28, 1 }
  0x93   : > { %v367_v43 = vsel %vm363_vm7, %v338_v34, 0.0  ;;  %v365_v44 = vsel %vm361_vm8, %v334_v35, 0.0 }
  0x94   : > { %v411_v52 = vadd.f32 %v407_v38, %v367_v43  ;;  %v409_v61 = vadd.f32 %v405_v59, %v365_v44 }
  0x96   : > { %v389_v39 = vpop.permute.xlu1 %388  ;;  %v386_v40 = vpop.permute.xlu0 %385 }
  0x97   : > { %vm397_vm9 = vcmp.eq.s32.totalorder %v389_v39, 1  ;;  %vm396_vm10 = vcmp.eq.s32.totalorder %v386_v40, 1 }
  0x98   : > { %v401_v45 = vsel %vm397_vm9, %v373_v36, 0.0  ;;  %v400_v46 = vsel %vm396_vm10, %v371_v37, 0.0 }
  0x99   : > { %v417_v47 = vsub.f32 %v365_v44, %v401_v45  ;;  %v412_v48 = vadd.f32 %v408_v25, %v400_v46  ;;  %v416_v49 = vsub.f32 %v364_v24, %v400_v46  ;;  %v413_v62 = vadd.f32 %v409_v61, %v401_v45 }
  0x9a   : > { %v392_v50 = vpop.permute.xlu1 %391  ;;  %v395_v51 = vpop.permute.xlu0 %394 }
  0x9b   : > { %vm398_vm12 = vcmp.eq.s32.totalorder %v392_v50, 1  ;;  %vm399_vm13 = vcmp.eq.s32.totalorder %v395_v51, 1  ;;  %464 = vrot.lane.b32.xlu0 %v417_v47, %s687_s12  ;;  %462 = vrot.lane.b32.xlu1 %v416_v49, %s687_s12  ;;  %v498_v10 = vmul.f32 2.0, %v416_v49  ;;  %v499_v12 = vmul.f32 2.0, %v417_v47 }
  0x9c   : > { %v402_v54 = vsel %vm398_vm12, %v375_v42, 0.0  ;;  %v403_v55 = vsel %vm399_vm13, %v383_v18, 0.0 }
  0x9d   : > { %v418_v56 = vsub.f32 %v366_v53, %v402_v54  ;;  %v415_v57 = vadd.f32 %v411_v52, %v403_v55  ;;  %v767_v58 = vsub.f32 %v367_v43, %v403_v55  ;;  %v414_v0 = vadd.f32 %v410_v63, %v402_v54 }
  0x9f   : > { %466 = vrot.lane.b32.xlu1 %v418_v56, %s687_s12  ;;  %468 = vrot.lane.b32.xlu0 %v767_v58, %s687_s12  ;;  %v500_v29 = vmul.f32 2.0, %v418_v56  ;;  %v501_v40 = vmul.f32 2.0, %v767_v58 }
  0xa3   : > { %478 = vrot.lane.b32.xlu1 %v416_v49, %s688_s13  ;;  %480 = vrot.lane.b32.xlu0 %v417_v47, %s688_s13 }
  0xa7   : > { %424 = vrot.lane.b32.xlu1 %v412_v48, %s687_s12  ;;  %426 = vrot.lane.b32.xlu0 %v413_v62, %s687_s12 }
  0xab   : > { %428 = vrot.lane.b32.xlu1 %v414_v0, %s687_s12  ;;  %430 = vrot.lane.b32.xlu0 %v415_v57, %s687_s12 }
  0xaf   : > { %441 = vrot.lane.b32.xlu1 %v412_v48, %s688_s13  ;;  %443 = vrot.lane.b32.xlu0 %v413_v62, %s688_s13 }
  0xb3   : > { %445 = vrot.lane.b32.xlu1 %v414_v0, %s688_s13  ;;  %447 = vrot.lane.b32.xlu0 %v415_v57, %s688_s13 }
  0xb7   : > { %482 = vrot.lane.b32.xlu1 %v418_v56, %s688_s13  ;;  %484 = vrot.lane.b32.xlu0 %v767_v58, %s688_s13 }
 0x10d   : > { %v463_v1 = vpop.permute.xlu1 %462  ;;  %v465_v2 = vpop.permute.xlu0 %464 }
 0x10e   : > { %v474_v9 = vsel %vm436_vm14, 0.0, %v463_v1  ;;  %v475_v11 = vsel %vm436_vm14, 0.0, %v465_v2 }
 0x10f   : > { %v502_v16 = vadd.f32 %v498_v10, %v474_v9  ;;  %v503_v18 = vadd.f32 %v499_v12, %v475_v11 }
 0x111   : > { %v467_v3 = vpop.permute.xlu1 %466  ;;  %v469_v4 = vpop.permute.xlu0 %468 }
 0x112   : > { %v476_v36 = vsel %vm436_vm14, 0.0, %v467_v3  ;;  %v477_v37 = vsel %vm436_vm14, 0.0, %v469_v4 }
 0x113   : > { %v504_v46 = vadd.f32 %v500_v29, %v476_v36  ;;  %v505_v47 = vadd.f32 %v501_v40, %v477_v37 }
 0x115   : > { %v479_v5 = vpop.permute.xlu1 %478  ;;  %v481_v6 = vpop.permute.xlu0 %480 }
 0x116   : > { %v490_v13 = vsel %vm453_vm15, %v479_v5, 0.0  ;;  %v491_v17 = vsel %vm453_vm15, %v481_v6, 0.0 }
 0x117   : > { %v506_v19 = vadd.f32 %v502_v16, %v490_v13  ;;  %v507_v20 = vadd.f32 %v503_v18, %v491_v17 }
 0x119   : > { %v425_v7 = vpop.permute.xlu1 %424  ;;  %v427_v8 = vpop.permute.xlu0 %426  ;;  %v514_v30 = vand.u32 2147483647, %v506_v19  ;;  %v515_v31 = vand.u32 2147483647, %v507_v20 }
 0x11a   : > { %v437_v23 = vsel %vm436_vm14, 0.0, %v425_v7  ;;  %v438_v24 = vsel %vm436_vm14, 0.0, %v427_v8 }
 0x11d   : > { %v429_v14 = vpop.permute.xlu1 %428  ;;  %v431_v15 = vpop.permute.xlu0 %430 }
 0x11e   : > { %v439_v41 = vsel %vm436_vm14, 0.0, %v429_v14  ;;  %v440_v44 = vsel %vm436_vm14, 0.0, %v431_v15 }
 0x121   : > { %v442_v21 = vpop.permute.xlu1 %441  ;;  %v444_v22 = vpop.permute.xlu0 %443 }
 0x122   : > { %v454_v25 = vsel %vm453_vm15, %v442_v21, 0.0  ;;  %v455_v26 = vsel %vm453_vm15, %v444_v22, 0.0 }
 0x123   : > { %v494_v27 = vsub.f32 %v437_v23, %v454_v25  ;;  %v495_v28 = vsub.f32 %v438_v24, %v455_v26 }
 0x125   : > { %v510_v32 = vand.u32 2147483647, %v494_v27  ;;  %v511_v33 = vand.u32 2147483647, %v495_v28  ;;  %v446_v34 = vpop.permute.xlu1 %445  ;;  %v448_v35 = vpop.permute.xlu0 %447 }
 0x126   : > { %v456_v38 = vsel %vm453_vm15, %v446_v34, 0.0  ;;  %v457_v39 = vsel %vm453_vm15, %v448_v35, 0.0 }
 0x127   : > { %v518_v42 = vadd.f32 %v514_v30, %v510_v32  ;;  %v519_v43 = vadd.f32 %v515_v31, %v511_v33  ;;  %v496_v45 = vsub.f32 %v439_v41, %v456_v38  ;;  %v497_v48 = vsub.f32 %v440_v44, %v457_v39 }
 0x129   : > { %523 = vst.msk [vmem:[%s311_s17] sm:$0xff] %vm522_vm0, %v518_v42  ;;  %524 = vst.msk [vmem:[%s311_s17 + $0x8] sm:$0xff] %vm522_vm0, %v519_v43  ;;  %v483_v49 = vpop.permute.xlu1 %482  ;;  %v485_v50 = vpop.permute.xlu0 %484  ;;  %v512_v55 = vand.u32 2147483647, %v496_v45  ;;  %v513_v56 = vand.u32 2147483647, %v497_v48 }
 0x12a   : > { %v492_v51 = vsel %vm453_vm15, %v483_v49, 0.0  ;;  %v493_v52 = vsel %vm453_vm15, %v485_v50, 0.0 }
 0x12b   : > { %v508_v53 = vadd.f32 %v504_v46, %v492_v51  ;;  %v509_v54 = vadd.f32 %v505_v47, %v493_v52 }
 0x12d   : > { %v516_v57 = vand.u32 2147483647, %v508_v53  ;;  %v517_v58 = vand.u32 2147483647, %v509_v54 }
 0x12f   : > { %v520_v59 = vadd.f32 %v516_v57, %v512_v55  ;;  %v521_v60 = vadd.f32 %v517_v58, %v513_v56 }
 0x131   : > { %525 = vst.msk [vmem:[%s311_s17 + $0x10] sm:$0xff] %vm522_vm0, %v520_v59  ;;  %526 = vst.msk [vmem:[%s311_s17 + $0x18] sm:$0xff] %vm522_vm0, %v521_v60 }
 0x132 PF: > { %s14_s15 = sadd.s32 1, %s683_s15  }
 0x133   : > { %p11_p7 = scmp.ge.s32.totalorder %s14_s15, 6  }
 0x135   :  { %13 = sbr.rel (!%p11_p7) target bundleno = 1 (0x1), region = 75 }

</bundles_post_ra>
